<compile_context>
chip_gen: v7x
topology: tpu7x:2x2x1
jax: 0.10.0
libtpu: 0.0.40
codegen_flags: <defaults>
</compile_context>

<pallas_src>
import functools

import jax
import jax.numpy as jnp
from jax.experimental import pallas as pl
from jax.experimental.pallas import tpu as pltpu

_EPS = 1e-8  # matches torch.nn.functional.cosine_similarity default eps


def _round_up(x, m):
    return (x + m - 1) // m * m


def _simsiam_kernel(p1_ref, p2_ref, z1_ref, z2_ref, o_ref, *,
                    batch_size, block_rows, steps_per_core, scale):
    c = pl.program_id(0)   # balanced "core" split axis (parallel)
    s = pl.program_id(1)   # accumulation axis (arbitrary)
    blk = c * steps_per_core + s

    # Global row indices of this block; rows >= true batch size are masked
    # (zero padding added in the wrapper).
    row = jax.lax.broadcasted_iota(jnp.int32, (block_rows, 1), 0) + blk * block_rows
    valid = row < batch_size  # [TB, 1] bool

    def pair_cos_sum(p_ref, z_ref):
        # Stream one (p, z) pair at a time -> at most two f32 tiles live at once.
        p = p_ref[...].astype(jnp.float32)
        z = z_ref[...].astype(jnp.float32)
        dot = jnp.sum(p * z, axis=1, keepdims=True)  # [TB, 1]
        sp = jnp.sum(p * p, axis=1, keepdims=True)
        sz = jnp.sum(z * z, axis=1, keepdims=True)
        # Match torch exactly: dot / max(||p|| * ||z||, eps).  Norms are taken
        # before the product so sp*sz cannot overflow f32 for large rows.
        denom = jnp.maximum(jnp.sqrt(sp) * jnp.sqrt(sz), _EPS)
        cos = dot / denom
        return jnp.sum(jnp.where(valid, cos, 0.0))

    block_sum = pair_cos_sum(p1_ref, z2_ref) + pair_cos_sum(p2_ref, z1_ref)

    # Fused reduction: per-core SMEM scalar accumulator (P3 pattern).
    @pl.when(s == 0)
    def _():
        o_ref[0, 0] = jnp.float32(0.0)

    o_ref[0, 0] += block_sum

    # Fold the -0.5 / B scale into the last accumulation step.
    @pl.when(s == steps_per_core - 1)
    def _():
        o_ref[0, 0] = o_ref[0, 0] * scale


def simsiam_loss(p1, p2, z1, z2, *, block_rows=None):
    """SimSiam loss via Pallas. p1, p2, z1, z2: [B, D]. Returns scalar float32."""
    assert p1.shape == p2.shape == z1.shape == z2.shape
    assert p1.ndim == 2
    B, D = p1.shape
    itemsize = jnp.dtype(p1.dtype).itemsize

    # Sublane packing: f32 -> 8 rows per vreg, bf16 -> 16, int8/fp8 -> 32.
    row_mult = max(8, 32 // max(itemsize, 1))
    b_pad = _round_up(B, row_mult)

    # Generation-aware VMEM budget (v7x: 64 MiB per TC, v5e/v6e: 128 MiB).
    try:
        vmem_capacity = int(pltpu.get_tpu_info().vmem_capacity_bytes)
    except Exception:  # be conservative if the query is unavailable
        vmem_capacity = 64 << 20
    vmem_ceiling = int(0.78 * vmem_capacity)  # keep Mosaic scratch headroom
    slack = 4 << 20

    # VMEM bytes per tile row: 4 inputs x 2 pipeline buffers + ~3 f32 temporaries.
    bytes_per_row = D * (8 * itemsize + 3 * 4)
    tb_cap = max(row_mult,
                 ((vmem_ceiling - slack) // bytes_per_row) // row_mult * row_mult)
    if block_rows is not None:  # optional user cap (useful for tests)
        tb_cap = max(row_mult, min(tb_cap, _round_up(block_rows, row_mult)))

    # Balanced split across (up to) two TensorCores; never a lopsided grid.
    n_split = 2 if b_pad > row_mult else 1
    steps = max(1, pl.cdiv(b_pad, n_split * tb_cap))
    tb = _round_up(pl.cdiv(b_pad, n_split * steps), row_mult)
    total_rows = n_split * steps * tb

    if total_rows != B:
        pad = ((0, total_rows - B), (0, 0))
        p1, p2, z1, z2 = (jnp.pad(a, pad) for a in (p1, p2, z1, z2))

    vmem_bytes = 8 * tb * D * itemsize + 3 * tb * D * 4 + slack
    vmem_limit = int(min(max(vmem_bytes, 32 << 20), vmem_ceiling))

    kernel = functools.partial(_simsiam_kernel, batch_size=B, block_rows=tb,
                               steps_per_core=steps, scale=-0.5 / B)
    in_spec = pl.BlockSpec((tb, D), lambda c, s, _steps=steps: (c * _steps + s, 0))

    partials = pl.pallas_call(
        kernel,
        out_shape=jax.ShapeDtypeStruct((n_split, 1), jnp.float32),
        grid=(n_split, steps),
        in_specs=[in_spec, in_spec, in_spec, in_spec],
        out_specs=pl.BlockSpec((1, 1), lambda c, s: (c, 0),
                               memory_space=pltpu.MemorySpace.SMEM),
        compiler_params=pltpu.CompilerParams(
            dimension_semantics=("parallel", "arbitrary"),
            vmem_limit_bytes=vmem_limit,
        ),
        cost_estimate=pl.CostEstimate(
            flops=12 * total_rows * D,
            transcendentals=4 * total_rows,
            bytes_accessed=4 * total_rows * D * itemsize + n_split * 4,
        ),
    )(p1, p2, z1, z2)

    # -0.5 / B scaling is already folded in per core; just sum the per-core partials.
    return jnp.sum(partials)


def _reference_loss(p1, p2, z1, z2):
    """Pure-JAX reference mirroring F.cosine_similarity semantics."""
    def neg_cos(p, z):
        p = p.astype(jnp.float32)
        z = z.astype(jnp.float32)
        dot = jnp.sum(p * z, axis=1)
        denom = jnp.maximum(
            jnp.linalg.norm(p, axis=1) * jnp.linalg.norm(z, axis=1), _EPS)
        return -jnp.mean(dot / denom)
    return 0.5 * (neg_cos(p1, z2) + neg_cos(p2, z1))


if __name__ == "__main__":
    key = jax.random.PRNGKey(0)

    def make_inputs(B, D, dtype):
        k1, k2, k3, k4 = jax.random.split(key, 4)
        mk = lambda k: jax.random.normal(k, (B, D), dtype=jnp.float32).astype(dtype)
        return mk(k1), mk(k2), mk(k3), mk(k4)

    # Case 1: small TPU-aligned shapes (single block, single split).
    p1, p2, z1, z2 = make_inputs(8, 128, jnp.float32)
    loss = jax.block_until_ready(simsiam_loss(p1, p2, z1, z2))
    ref = jax.block_until_ready(_reference_loss(p1, p2, z1, z2))
    assert jnp.allclose(loss, ref, atol=1e-5, rtol=1e-5), (loss, ref)

    # Case 2: multi-step grid with a batch remainder (exercises 2-way split,
    # per-core accumulation and row masking).
    p1, p2, z1, z2 = make_inputs(20, 256, jnp.float32)
    loss = jax.block_until_ready(simsiam_loss(p1, p2, z1, z2, block_rows=8))
    ref = jax.block_until_ready(_reference_loss(p1, p2, z1, z2))
    assert jnp.allclose(loss, ref, atol=1e-5, rtol=1e-5), (loss, ref)

    # Case 3: bf16 inputs (half the HBM bytes; f32 accumulation in-kernel).
    p1, p2, z1, z2 = make_inputs(32, 128, jnp.bfloat16)
    loss = jax.block_until_ready(simsiam_loss(p1, p2, z1, z2, block_rows=16))
    ref = jax.block_until_ready(_reference_loss(p1, p2, z1, z2))
    assert jnp.allclose(loss, ref, atol=1e-4, rtol=1e-4), (loss, ref)

    # Case 4: feature dim not a multiple of 128 (lane-padded tail must not
    # leak into the axis=1 reductions).
    p1, p2, z1, z2 = make_inputs(16, 100, jnp.float32)
    loss = jax.block_until_ready(simsiam_loss(p1, p2, z1, z2))
    ref = jax.block_until_ready(_reference_loss(p1, p2, z1, z2))
    assert jnp.allclose(loss, ref, atol=1e-5, rtol=1e-5), (loss, ref)

    print("KERNEL_OK")
</pallas_src>

<mosaic_0001>
module attributes {stable_mosaic.version = 11 : i64} {
  func.func @_simsiam_kernel(%arg0: i32, %arg1: i32, %arg2: memref<8x128xf32, #tpu.memory_space<vmem>>, %arg3: memref<8x128xf32, #tpu.memory_space<vmem>>, %arg4: memref<8x128xf32, #tpu.memory_space<vmem>>, %arg5: memref<8x128xf32, #tpu.memory_space<vmem>>, %arg6: memref<1x1xf32, #tpu.memory_space<smem>>) attributes {dimension_semantics = [#tpu.dimension_semantics<parallel>, #tpu.dimension_semantics<arbitrary>], iteration_bounds = array<i64: 1, 1>, scalar_prefetch = 0 : i64, scratch_operands = 0 : i64, tpu.core_type = #tpu.core_type<tc>, window_params = [{transform_indices = @transform_0, window_bounds = array<i64: 8, 128>}, {transform_indices = @transform_1, window_bounds = array<i64: 8, 128>}, {transform_indices = @transform_2, window_bounds = array<i64: 8, 128>}, {transform_indices = @transform_3, window_bounds = array<i64: 8, 128>}, {transform_indices = @transform_4, window_bounds = array<i64: 1, 1>}]} {
    %c1_i32 = arith.constant 1 : i32
    %0 = arith.muli %arg0, %c1_i32 : i32
    %1 = arith.addi %0, %arg1 : i32
    %2 = tpu.iota {dimensions = array<i32: 0>} : vector<8x1xi32>
    %c8_i32 = arith.constant 8 : i32
    %3 = arith.muli %1, %c8_i32 : i32
    %4 = vector.broadcast %3 : i32 to vector<8x1xi32>
    %5 = arith.addi %2, %4 : vector<8x1xi32>
    %c8_i32_0 = arith.constant 8 : i32
    %6 = vector.broadcast %c8_i32_0 : i32 to vector<8x1xi32>
    %7 = arith.cmpi slt, %5, %6 : vector<8x1xi32>
    %c0 = arith.constant 0 : index
    %c0_1 = arith.constant 0 : index
    %8 = vector.load %arg2[%c0, %c0_1] : memref<8x128xf32, #tpu.memory_space<vmem>>, vector<8x128xf32>
    %c0_2 = arith.constant 0 : index
    %c0_3 = arith.constant 0 : index
    %9 = vector.load %arg5[%c0_2, %c0_3] : memref<8x128xf32, #tpu.memory_space<vmem>>, vector<8x128xf32>
    %10 = arith.mulf %8, %9 : vector<8x128xf32>
    %cst = arith.constant dense<0.000000e+00> : vector<8xf32>
    %11 = vector.multi_reduction <add>, %10, %cst [1] : vector<8x128xf32> to vector<8xf32>
    %12 = vector.shape_cast %11 : vector<8xf32> to vector<8x1xf32>
    %13 = arith.mulf %8, %8 : vector<8x128xf32>
    %cst_4 = arith.constant dense<0.000000e+00> : vector<8xf32>
    %14 = vector.multi_reduction <add>, %13, %cst_4 [1] : vector<8x128xf32> to vector<8xf32>
    %15 = vector.shape_cast %14 : vector<8xf32> to vector<8x1xf32>
    %16 = arith.mulf %9, %9 : vector<8x128xf32>
    %cst_5 = arith.constant dense<0.000000e+00> : vector<8xf32>
    %17 = vector.multi_reduction <add>, %16, %cst_5 [1] : vector<8x128xf32> to vector<8xf32>
    %18 = vector.shape_cast %17 : vector<8xf32> to vector<8x1xf32>
    %19 = math.sqrt %15 : vector<8x1xf32>
    %20 = math.sqrt %18 : vector<8x1xf32>
    %21 = arith.mulf %19, %20 : vector<8x1xf32>
    %cst_6 = arith.constant 9.99999993E-9 : f32
    %22 = vector.broadcast %cst_6 : f32 to vector<8x1xf32>
    %23 = arith.maximumf %21, %22 : vector<8x1xf32>
    %24 = arith.divf %12, %23 : vector<8x1xf32>
    %cst_7 = arith.constant 0.000000e+00 : f32
    %25 = vector.broadcast %cst_7 : f32 to vector<8x1xf32>
    %26 = arith.select %7, %24, %25 : vector<8x1xi1>, vector<8x1xf32>
    %27 = vector.shape_cast %26 : vector<8x1xf32> to vector<1x8x1xf32>
    %cst_8 = arith.constant dense<0.000000e+00> : vector<1xf32>
    %28 = vector.multi_reduction <add>, %27, %cst_8 [1, 2] : vector<1x8x1xf32> to vector<1xf32>
    %29 = vector.shape_cast %28 : vector<1xf32> to vector<1x1x1xf32>
    %30 = vector.extract %29[0, 0, 0] : f32 from vector<1x1x1xf32>
    %c0_9 = arith.constant 0 : index
    %c0_10 = arith.constant 0 : index
    %31 = vector.load %arg3[%c0_9, %c0_10] : memref<8x128xf32, #tpu.memory_space<vmem>>, vector<8x128xf32>
    %c0_11 = arith.constant 0 : index
    %c0_12 = arith.constant 0 : index
    %32 = vector.load %arg4[%c0_11, %c0_12] : memref<8x128xf32, #tpu.memory_space<vmem>>, vector<8x128xf32>
    %33 = arith.mulf %31, %32 : vector<8x128xf32>
    %cst_13 = arith.constant dense<0.000000e+00> : vector<8xf32>
    %34 = vector.multi_reduction <add>, %33, %cst_13 [1] : vector<8x128xf32> to vector<8xf32>
    %35 = vector.shape_cast %34 : vector<8xf32> to vector<8x1xf32>
    %36 = arith.mulf %31, %31 : vector<8x128xf32>
    %cst_14 = arith.constant dense<0.000000e+00> : vector<8xf32>
    %37 = vector.multi_reduction <add>, %36, %cst_14 [1] : vector<8x128xf32> to vector<8xf32>
    %38 = vector.shape_cast %37 : vector<8xf32> to vector<8x1xf32>
    %39 = arith.mulf %32, %32 : vector<8x128xf32>
    %cst_15 = arith.constant dense<0.000000e+00> : vector<8xf32>
    %40 = vector.multi_reduction <add>, %39, %cst_15 [1] : vector<8x128xf32> to vector<8xf32>
    %41 = vector.shape_cast %40 : vector<8xf32> to vector<8x1xf32>
    %42 = math.sqrt %38 : vector<8x1xf32>
    %43 = math.sqrt %41 : vector<8x1xf32>
    %44 = arith.mulf %42, %43 : vector<8x1xf32>
    %cst_16 = arith.constant 9.99999993E-9 : f32
    %45 = vector.broadcast %cst_16 : f32 to vector<8x1xf32>
    %46 = arith.maximumf %44, %45 : vector<8x1xf32>
    %47 = arith.divf %35, %46 : vector<8x1xf32>
    %cst_17 = arith.constant 0.000000e+00 : f32
    %48 = vector.broadcast %cst_17 : f32 to vector<8x1xf32>
    %49 = arith.select %7, %47, %48 : vector<8x1xi1>, vector<8x1xf32>
    %50 = vector.shape_cast %49 : vector<8x1xf32> to vector<1x8x1xf32>
    %cst_18 = arith.constant dense<0.000000e+00> : vector<1xf32>
    %51 = vector.multi_reduction <add>, %50, %cst_18 [1, 2] : vector<1x8x1xf32> to vector<1xf32>
    %52 = vector.shape_cast %51 : vector<1xf32> to vector<1x1x1xf32>
    %53 = vector.extract %52[0, 0, 0] : f32 from vector<1x1x1xf32>
    %54 = arith.addf %30, %53 : f32
    %c0_i32 = arith.constant 0 : i32
    %55 = arith.cmpi eq, %arg1, %c0_i32 : i32
    %56 = arith.extui %55 : i1 to i32
    %c0_i32_19 = arith.constant 0 : i32
    %57 = arith.cmpi ne, %56, %c0_i32_19 : i32
    scf.if %57 {
      %cst_26 = arith.constant 0.000000e+00 : f32
      %c0_27 = arith.constant 0 : index
      %c0_28 = arith.constant 0 : index
      %64 = memref.load %arg6[%c0_27, %c0_28] : memref<1x1xf32, #tpu.memory_space<smem>>
      memref.store %cst_26, %arg6[%c0_27, %c0_28] : memref<1x1xf32, #tpu.memory_space<smem>>
    } else {
    }
    %c0_20 = arith.constant 0 : index
    %c0_21 = arith.constant 0 : index
    %58 = memref.load %arg6[%c0_20, %c0_21] : memref<1x1xf32, #tpu.memory_space<smem>>
    %59 = arith.addf %58, %54 : f32
    %c0_22 = arith.constant 0 : index
    %c0_23 = arith.constant 0 : index
    %60 = memref.load %arg6[%c0_22, %c0_23] : memref<1x1xf32, #tpu.memory_space<smem>>
    memref.store %59, %arg6[%c0_22, %c0_23] : memref<1x1xf32, #tpu.memory_space<smem>>
    %c0_i32_24 = arith.constant 0 : i32
    %61 = arith.cmpi eq, %arg1, %c0_i32_24 : i32
    %62 = arith.extui %61 : i1 to i32
    %c0_i32_25 = arith.constant 0 : i32
    %63 = arith.cmpi ne, %62, %c0_i32_25 : i32
    scf.if %63 {
      %c0_26 = arith.constant 0 : index
      %c0_27 = arith.constant 0 : index
      %64 = memref.load %arg6[%c0_26, %c0_27] : memref<1x1xf32, #tpu.memory_space<smem>>
      %cst_28 = arith.constant -6.250000e-02 : f32
      %65 = arith.mulf %64, %cst_28 : f32
      %c0_29 = arith.constant 0 : index
      %c0_30 = arith.constant 0 : index
      %66 = memref.load %arg6[%c0_29, %c0_30] : memref<1x1xf32, #tpu.memory_space<smem>>
      memref.store %65, %arg6[%c0_29, %c0_30] : memref<1x1xf32, #tpu.memory_space<smem>>
    } else {
    }
    return
  }
  func.func @transform_0(%arg0: i32, %arg1: i32) -> (i32, i32) {
    %c1_i32 = arith.constant 1 : i32
    %0 = arith.muli %arg0, %c1_i32 : i32
    %1 = arith.addi %0, %arg1 : i32
    %c0_i32 = arith.constant 0 : i32
    %c0_i32_0 = arith.constant 0 : i32
    return %1, %c0_i32 : i32, i32
  }
  func.func @transform_1(%arg0: i32, %arg1: i32) -> (i32, i32) {
    %c1_i32 = arith.constant 1 : i32
    %0 = arith.muli %arg0, %c1_i32 : i32
    %1 = arith.addi %0, %arg1 : i32
    %c0_i32 = arith.constant 0 : i32
    %c0_i32_0 = arith.constant 0 : i32
    return %1, %c0_i32 : i32, i32
  }
  func.func @transform_2(%arg0: i32, %arg1: i32) -> (i32, i32) {
    %c1_i32 = arith.constant 1 : i32
    %0 = arith.muli %arg0, %c1_i32 : i32
    %1 = arith.addi %0, %arg1 : i32
    %c0_i32 = arith.constant 0 : i32
    %c0_i32_0 = arith.constant 0 : i32
    return %1, %c0_i32 : i32, i32
  }
  func.func @transform_3(%arg0: i32, %arg1: i32) -> (i32, i32) {
    %c1_i32 = arith.constant 1 : i32
    %0 = arith.muli %arg0, %c1_i32 : i32
    %1 = arith.addi %0, %arg1 : i32
    %c0_i32 = arith.constant 0 : i32
    %c0_i32_0 = arith.constant 0 : i32
    return %1, %c0_i32 : i32, i32
  }
  func.func @transform_4(%arg0: i32, %arg1: i32) -> (i32, i32) {
    %c0_i32 = arith.constant 0 : i32
    %c0_i32_0 = arith.constant 0 : i32
    return %arg0, %c0_i32 : i32, i32
  }
}

</mosaic_0001>

<bundles_post_ra>
// kernel: tpu_custom_call.1
= control target key start
LH: loop header
LB: loop body
LE: loop exit
PB: predicated region body
PF: predicated region fallthrough
CT: control target
= control target key end

     0   :  { %9 = vsyncpa [#allocation3], 0  ;;  %s393_s0 = inlined_call_operand.hbm [shape: f32[8,128], index: 0, kind: input, shape index: {}]   ;;  %s394_s1 = inlined_call_operand.hbm [shape: f32[8,128], index: 1, kind: input, shape index: {}]   ;;  %s395_s2 = inlined_call_operand.hbm [shape: f32[8,128], index: 2, kind: input, shape index: {}]   ;;  %s396_s3 = inlined_call_operand.vmem [shape: f32[8,128], index: 3, kind: input, shape index: {}]   ;;  %s397_s4 = inlined_call_operand.hbm [shape: f32[1,1], index: 4, kind: output, shape index: {}]  }
   0x1   :  { %10 = vsyncpa [#allocation6], 0 }
   0x2   :  { %11 = vsyncpa [#allocation4], 0  ;;  %s311_s15 = smov [#allocation5]   ;;  %s312_s17 = smov [#allocation2]  }
   0x3   :  { %s34_s16 = sshll.u32 %s311_s15, 4  ;;  %s21_s18 = sshll.u32 %s312_s17, 4  ;;  %s35_s16 = int_to_ptr.vmem [resolvable:$true] %s34_s16  ;;  %s22_s18 = int_to_ptr.vmem [resolvable:$true] %s21_s18 }
   0x4   :  { %s229_s21 = scalar_lea.hbm %s394_s1, 128 }
   0x5   :  { %p230_p0 = scmp.ne.s32.totalorder %s394_s1, %s229_s21  ;;  %p233_p1 = scmp.lt.u32.totalorder %s229_s21, %s394_s1 }
   0x7   :  { %p235_p2 = pnand %p233_p1, %p230_p0 }
   0x9   :  { %238 = shalt.err (!%p235_p2)
}
   0xa   :  { %s239_s26 = scalar_lea.vmem %s35_s16, 128  ;;  %p244_p4 = scmp.lt.s32.totalorder %s35_s16, %s35_s16 }
   0xb   :  { %p240_p3 = scmp.ne.s32.totalorder %s35_s16, %s239_s26  ;;  %p245_p5 = scmp.lt.s32.totalorder %s239_s26, %s239_s26 }
   0xd   :  { %p246_p6 = por %p245_p5, %p244_p4 }
   0xf   :  { %p247_p7 = pnand %p246_p6, %p240_p3 }
  0x11   :  { %250 = shalt.err (!%p247_p7)
}
  0x12   :  { %37 = dma.hbm_to_vmem [thread:$0]  %s394_s1, 128, %s35_s16, [#allocation6]  }
  0x13   :  { %s251_s5 = scalar_lea.hbm %s393_s0, 128 }
  0x14   :  { %p252_p8 = scmp.ne.s32.totalorder %s393_s0, %s251_s5  ;;  %p255_p9 = scmp.lt.u32.totalorder %s251_s5, %s393_s0 }
  0x16   :  { %p257_p10 = pnand %p255_p9, %p252_p8 }
  0x18   :  { %260 = shalt.err (!%p257_p10)
}
  0x19   :  { %s261_s10 = scalar_lea.vmem %s22_s18, 128  ;;  %p266_p12 = scmp.lt.s32.totalorder %s22_s18, %s22_s18 }
  0x1a   :  { %p262_p11 = scmp.ne.s32.totalorder %s22_s18, %s261_s10  ;;  %p267_p13 = scmp.lt.s32.totalorder %s261_s10, %s261_s10 }
  0x1c   :  { %p268_p0 = por %p267_p13, %p266_p12 }
  0x1e   :  { %p269_p1 = pnand %p268_p0, %p262_p11 }
  0x20   :  { %272 = shalt.err (!%p269_p1)
}
  0x21   :  { %24 = dma.hbm_to_vmem [thread:$0]  %s393_s0, 128, %s22_s18, [#allocation3]  }
  0x22   :  { %s313_s12 = smov [#allocation7]   ;;  %s273_s16 = scalar_lea.hbm %s395_s2, 128 }
  0x23   :  { %s47_s13 = sshll.u32 %s313_s12, 4  ;;  %p274_p2 = scmp.ne.s32.totalorder %s395_s2, %s273_s16  ;;  %s48_s13 = int_to_ptr.vmem [resolvable:$true] %s47_s13 }
  0x24   :  { %p277_p3 = scmp.lt.u32.totalorder %s273_s16, %s395_s2 }
  0x26   :  { %p279_p4 = pnand %p277_p3, %p274_p2 }
  0x28   :  { %282 = shalt.err (!%p279_p4)
}
  0x29   :  { %s283_s22 = scalar_lea.vmem %s48_s13, 128  ;;  %p288_p6 = scmp.lt.s32.totalorder %s48_s13, %s48_s13 }
  0x2a   :  { %p284_p5 = scmp.ne.s32.totalorder %s48_s13, %s283_s22  ;;  %p289_p7 = scmp.lt.s32.totalorder %s283_s22, %s283_s22 }
  0x2c   :  { %p290_p8 = por %p289_p7, %p288_p6 }
  0x2e   :  { %p291_p9 = pnand %p290_p8, %p284_p5 }
  0x30   :  { %294 = shalt.err (!%p291_p9)
}
  0x31   :  { %50 = dma.hbm_to_vmem [thread:$0]  %s395_s2, 128, %s48_s13, [#allocation6]  }
  0x32   :  { %305 = dma.done.wait [#allocation3], 128  }
  0x33   :  { %306 = vsyncadd [#allocation3], 4294967168 }
  0x34   :  { %307 = dma.done.wait [#allocation6], 256  }
  0x35   :  { %308 = vsyncadd [#allocation6], 4294967040  ;;  %v130_v0 = vld [vmem:[#allocation5] sm:$0xff]  ;;  %v89_v1 = vld [vmem:[#allocation2] sm:$0xff]  ;;  %vm119_vm8 = vcmask 7168   ;;  %s295_s29 = scalar_lea.hbm %s397_s4, 16 }
  0x36   :  { %v131_v2 = vld [vmem:[#allocation7] sm:$0xff]  ;;  %v135_v3 = vmul.f32 %v130_v0, %v130_v0  ;;  %v94_v4 = vmul.f32 %v89_v1, %v89_v1  ;;  %v90_v5 = vld [vmem:[%s396_s3] sm:$0xff]  ;;  %p296_p10 = scmp.ne.s32.totalorder %s397_s4, %s295_s29  ;;  %p299_p11 = scmp.lt.u32.totalorder %s295_s29, %s397_s4 }
  0x37   :  { %v138_v6 = vmul.f32 %v131_v2, %v131_v2  ;;  %v97_v7 = vmul.f32 %v90_v5, %v90_v5  ;;  %v132_v8 = vmul.f32 %v131_v2, %v130_v0  ;;  %v91_v9 = vmul.f32 %v90_v5, %v89_v1 }
  0x38   :  { %136 = vadd.xlane.f32.xlu1 %v135_v3  ;;  %95 = vadd.xlane.f32.xlu0 %v94_v4  ;;  %p301_p12 = pnand %p299_p11, %p296_p10 }
  0x3c   :  { %139 = vadd.xlane.f32.xlu1 %v138_v6  ;;  %98 = vadd.xlane.f32.xlu0 %v97_v7 }
  0x40   :  { %133 = vadd.xlane.f32.xlu1 %v132_v8  ;;  %92 = vadd.xlane.f32.xlu0 %v91_v9 }
  0xc5   :  { %v137_v10 = vpop.xlane.xlu1 %136  ;;  %v96_v11 = vpop.xlane.xlu0 %95 }
  0xc6   :  { %217 = vrsqrt.f32 %v137_v10  ;;  %vm143_vm0 = vcmp.eq.f32.partialorder %v137_v10, inf  ;;  %vm145_vm1 = vcmp.eq.f32.partialorder %v137_v10, 0.0  ;;  %v146_v19 = vand.u32 2147483648, %v137_v10 }
  0xc7   :  { %219 = vrsqrt.f32 %v96_v11  ;;  %vm102_vm2 = vcmp.eq.f32.partialorder %v96_v11, inf  ;;  %vm104_vm3 = vcmp.eq.f32.partialorder %v96_v11, 0.0  ;;  %v105_v22 = vand.u32 2147483648, %v96_v11 }
  0xc9   :  { %v140_v12 = vpop.xlane.xlu1 %139  ;;  %v99_v13 = vpop.xlane.xlu0 %98 }
  0xca   :  { %221 = vrsqrt.f32 %v140_v12  ;;  %vm150_vm4 = vcmp.eq.f32.partialorder %v140_v12, inf  ;;  %v153_v25 = vand.u32 2147483648, %v140_v12  ;;  %vm152_vm5 = vcmp.eq.f32.partialorder %v140_v12, 0.0 }
  0xcb   :  { %223 = vrsqrt.f32 %v99_v13  ;;  %vm109_vm6 = vcmp.eq.f32.partialorder %v99_v13, inf  ;;  %v112_v28 = vand.u32 2147483648, %v99_v13  ;;  %vm111_vm7 = vcmp.eq.f32.partialorder %v99_v13, 0.0 }
  0xcd   :  { %v134_v38 = vpop.xlane.xlu1 %133  ;;  %v93_v39 = vpop.xlane.xlu0 %92 }
  0xd0   :  { %v218_v14 = vpop.eup %217 }
  0xd1   :  { %v220_v15 = vpop.eup %219  ;;  %v142_v16 = vmul.f32 %v218_v14, %v137_v10 }
  0xd2   :  { %v101_v17 = vmul.f32 %v220_v15, %v96_v11 }
  0xd3   :  { %v144_v21 = vsel %vm143_vm0, %v137_v10, %v142_v16 }
  0xd4   :  { %v222_v18 = vpop.eup %221  ;;  %v103_v24 = vsel %vm102_vm2, %v96_v11, %v101_v17  ;;  %v147_v30 = vsel %vm145_vm1, %v146_v19, %v144_v21 }
  0xd5   :  { %v224_v20 = vpop.eup %223  ;;  %v149_v23 = vmul.f32 %v222_v18, %v140_v12  ;;  %v106_v33 = vsel %vm104_vm3, %v105_v22, %v103_v24 }
  0xd6   :  { %v108_v26 = vmul.f32 %v224_v20, %v99_v13 }
  0xd7   :  { %v151_v27 = vsel %vm150_vm4, %v140_v12, %v149_v23 }
  0xd8   :  { %v110_v29 = vsel %vm109_vm6, %v99_v13, %v108_v26  ;;  %v154_v31 = vsel %vm152_vm5, %v153_v25, %v151_v27 }
  0xd9   :  { %v155_v32 = vmul.f32 %v154_v31, %v147_v30  ;;  %v113_v34 = vsel %vm111_vm7, %v112_v28, %v110_v29 }
  0xda   :  { %v114_v35 = vmul.f32 %v113_v34, %v106_v33 }
  0xdb   :  { %v156_v36 = vmax.f32 %v155_v32, 1e-08 }
  0xdc   :  { %v115_v37 = vmax.f32 %v114_v35, 1e-08 }
  0xdd   :  { %225 = vrcp.f32 %v156_v36 }
  0xde   :  { %227 = vrcp.f32 %v115_v37 }
  0xe7   :  { %v226_v40 = vpop.eup %225 }
  0xe8   :  { %v228_v41 = vpop.eup %227  ;;  %v158_v42 = vmul.f32 %v226_v40, %v134_v38 }
  0xe9   :  { %v117_v43 = vmul.f32 %v228_v41, %v93_v39 }
  0xea   :  { %v160_v44 = vsel %vm119_vm8, %v158_v42, 0.0 }
  0xeb   :  { %161 = vadd.xlane.f32.xlu1 %v160_v44  ;;  %v120_v45 = vsel %vm119_vm8, %v117_v43, 0.0 }
  0xec   :  { %121 = vadd.xlane.f32.xlu0 %v120_v45 }
 0x178   :  { %v162_v46 = vpop.xlane.xlu1 %161 }
 0x179   :  { %v163_v47 = vrot.slane %v162_v46, 4  ;;  %v122_v48 = vpop.xlane.xlu0 %121 }
 0x17a   :  { %v123_v49 = vrot.slane %v122_v48, 4 }
 0x17b   :  { %v164_v50 = vadd.f32 %v163_v47, %v162_v46 }
 0x17c   :  { %v124_v51 = vadd.f32 %v123_v49, %v122_v48 }
 0x17d   :  { %v165_v52 = vrot.slane %v164_v50, 2 }
 0x17e   :  { %v125_v53 = vrot.slane %v124_v51, 2 }
 0x17f   :  { %v166_v54 = vadd.f32 %v165_v52, %v164_v50 }
 0x180   :  { %v126_v55 = vadd.f32 %v125_v53, %v124_v51 }
 0x181   :  { %v167_v56 = vrot.slane %v166_v54, 1 }
 0x182   :  { %v127_v57 = vrot.slane %v126_v55, 1 }
 0x183   :  { %v168_v58 = vadd.f32 %v167_v56, %v166_v54 }
 0x184   :  { %v128_v59 = vadd.f32 %v127_v57, %v126_v55 }
 0x186   :  { %208 = vpush %v128_v59 }
 0x187   :  { %210 = vpush %v168_v58 }
 0x1b7   :  { %s209_s2 = spop %208 }
 0x1b8   :  { %s211_s3 = spop %210 }
 0x1b9   :  { %s170_s25 = sadd.f32 %s211_s3, %s209_s2 }
 0x1bb   :  { %s185_s26 = smul.f32 -0.0625, %s170_s25 }
 0x1bd   :  { %186 = sst [smem:[#allocation8]] %s185_s26 }
 0x1be   :  { %304 = shalt.err (!%p301_p12)
}
 0x1bf   :  { %s314_s8 = smov [#allocation8]  }
 0x1c0   :  { %194 = dma.smem_to_hbm %s314_s8, 16, %s397_s4, [#allocation4]  }
 0x1c1   :  { %309 = dma.done.wait [#allocation4], 16  }
 0x1c2   :  { %310 = vsyncadd [#allocation4], 4294967280 }
 0x1c3   :  { %198 = sfence }
 0x1c4   :  { %199 = vsyncpa [#allocation3], 1 }
 0x1c5   :  { %200 = vsyncpa [#allocation6], 1 }
 0x1c6   :  { %201 = vsyncpa [#allocation4], 1 }

</bundles_post_ra>
